<compile_context>
chip_gen: v6e
topology: v6e:2x2x1
jax: 0.10.0
libtpu: 0.0.40
codegen_flags: <defaults>
</compile_context>

<pallas_src>
import functools

import jax
import jax.numpy as jnp
from jax.experimental import pallas as pl
from jax.experimental.pallas import tpu as pltpu


def _round_up(n, m):
    return ((n + m - 1) // m) * m


def _temporal_block_kernel(x_ref, w1d_ref, w2_ref, o_ref, *, K, dilation):
    """Fully-fused TemporalBlock forward, single invocation (no grid)."""
    B, C_in, L = x_ref.shape
    BL = B * L
    C_out = w1d_ref.shape[0] // 2                    # fused weight: [conv1 ; downsample]
    C_pad1 = (w1d_ref.shape[1] - 1) // K             # channel dim padded to sublane tile
    C_pad2 = (w2_ref.shape[1] - 1) // K

    # Batch concatenated along the lane axis: (C_in, B*L).
    if B > 1:
        x = jnp.concatenate([x_ref[b] for b in range(B)], axis=-1)
    else:
        x = x_ref[0]
    x = x.astype(jnp.float32)
    if C_pad1 > C_in:                                # zero channels -> aligned tap blocks
        x = jnp.concatenate(
            [x, jnp.zeros((C_pad1 - C_in, BL), jnp.float32)], axis=0)

    ones_row = jnp.ones((1, BL), jnp.float32)

    def causal_taps(v):
        """Register-built im2col slab: for tap t, v shifted right (within each
        batch block) by s=(K-1-t)*dilation with zero fill -- exactly
        Conv1d(padding=(K-1)*d) + Chomp1d. A trailing ones row folds the bias
        into the matmul."""
        rows = v.shape[0]
        lane_local = jax.lax.broadcasted_iota(jnp.int32, (rows, BL), 1) % L
        taps = []
        for t in range(K):
            s = (K - 1 - t) * dilation
            if s == 0:
                taps.append(v)
            else:
                shifted = jnp.concatenate(
                    [jnp.zeros((rows, s), jnp.float32), v[:, :BL - s]], axis=-1)
                # zero the first s lanes of EVERY batch block (no cross-batch bleed)
                taps.append(jnp.where(lane_local >= s, shifted, 0.0))
        taps.append(ones_row)
        return jnp.concatenate(taps, axis=0)         # (K*C_pad + 1, B*L)

    # conv1 (causal dilated, weight-normed) + 1x1 downsample fused into ONE
    # MXU matmul; rows [0, C_out) are conv1, rows [C_out, 2*C_out) are the
    # downsample (its columns sit on the unshifted tap t = K-1).
    slab1 = causal_taps(x)
    y1 = jnp.dot(w1d_ref[...], slab1, preferred_element_type=jnp.float32)
    out1 = jnp.maximum(y1[:C_out], 0.0)              # relu1 (dropout1 = identity)
    res = y1[C_out:]                                 # residual branch, no relu

    if C_pad2 > C_out:
        out1 = jnp.concatenate(
            [out1, jnp.zeros((C_pad2 - C_out, BL), jnp.float32)], axis=0)

    # conv2 (same construction), relu2, residual add, final relu.
    slab2 = causal_taps(out1)
    y2 = jnp.dot(w2_ref[...], slab2, preferred_element_type=jnp.float32)
    out2 = jnp.maximum(y2, 0.0)                      # relu2 (dropout2 = identity)
    y = jnp.maximum(out2 + res, 0.0)                 # (C_out, B*L)

    for b in range(B):                               # static unroll, static slices
        o_ref[b] = y[:, b * L:(b + 1) * L].astype(o_ref.dtype)


def temporal_block_forward(x_ncl, packed, *, kernel_size, dilation):
    """x_ncl: (B, C_in, L) PyTorch NCL layout. Returns (B, C_out, L) float32."""
    B, C_in, L = x_ncl.shape
    C_out = packed["w2"].shape[0]
    assert (kernel_size - 1) * dilation < L, "demo kernel assumes causal pad < L"

    kernel = functools.partial(
        _temporal_block_kernel, K=kernel_size, dilation=dilation)
    vmem = pl.BlockSpec(memory_space=pltpu.MemorySpace.VMEM)
    # Single invocation, everything VMEM/vreg resident: at these sizes the
    # workload is launch/DMA-overhead bound, so one fused step wins.
    return pl.pallas_call(
        kernel,
        out_shape=jax.ShapeDtypeStruct((B, C_out, L), jnp.float32),
        in_specs=[vmem, vmem, vmem],
        out_specs=vmem,
    )(x_ncl.astype(jnp.float32), packed["w1d"], packed["w2"])


def apply_weight_norm(v, g):
    """PyTorch weight_norm(dim=0): w = g * v / ||v||, norm over all dims but 0."""
    norm = jnp.sqrt(jnp.sum(v * v, axis=(1, 2), keepdims=True))
    return g.reshape(-1, 1, 1) * v / norm


def init_params(key, n_inputs, n_outputs, kernel_size):
    """Raw parameters, PyTorch Conv1d layout (C_out, C_in, K); g = ||v|| at init."""
    ks = jax.random.split(key, 6)
    v1 = 0.01 * jax.random.normal(ks[0], (n_outputs, n_inputs, kernel_size), jnp.float32)
    b1 = 0.01 * jax.random.normal(ks[1], (n_outputs,), jnp.float32)
    v2 = 0.01 * jax.random.normal(ks[2], (n_outputs, n_outputs, kernel_size), jnp.float32)
    b2 = 0.01 * jax.random.normal(ks[3], (n_outputs,), jnp.float32)
    g1 = jnp.sqrt(jnp.sum(v1 * v1, axis=(1, 2)))
    g2 = jnp.sqrt(jnp.sum(v2 * v2, axis=(1, 2)))
    if n_inputs != n_outputs:
        wd = 0.01 * jax.random.normal(ks[4], (n_outputs, n_inputs, 1), jnp.float32)
        bd = 0.01 * jax.random.normal(ks[5], (n_outputs,), jnp.float32)
    else:
        wd, bd = None, None                           # identity residual
    return dict(v1=v1, g1=g1, b1=b1, v2=v2, g2=g2, b2=b2, wd=wd, bd=bd)


def effective_weights(raw):
    return dict(w1=apply_weight_norm(raw["v1"], raw["g1"]), b1=raw["b1"],
                w2=apply_weight_norm(raw["v2"], raw["g2"]), b2=raw["b2"],
                wd=raw["wd"], bd=raw["bd"])


def pack_params(eff, *, kernel_size):
    """One-time host-side packing into the kernel's fused, im2col-flattened,
    bias-folded layout (channel dim zero-padded to a multiple of 8)."""
    K = kernel_size
    w1, w2 = eff["w1"], eff["w2"]
    C_out, C_in, _ = w1.shape
    C_pad1 = _round_up(C_in, 8)
    C_pad2 = _round_up(C_out, 8)

    def flat(w, c_pad):  # (C_out, C_in, K) -> (C_out, K*c_pad), col = t*c_pad + c
        co, ci, _ = w.shape
        wp = jnp.pad(w, ((0, 0), (0, c_pad - ci), (0, 0)))
        return jnp.transpose(wp, (0, 2, 1)).reshape(co, K * c_pad)

    if eff["wd"] is not None:
        wd = eff["wd"][:, :, 0].astype(jnp.float32)   # (C_out, C_in)
        bd = eff["bd"].astype(jnp.float32)
    else:                                             # identity residual path
        wd = jnp.eye(C_out, dtype=jnp.float32)
        bd = jnp.zeros((C_out,), jnp.float32)
    wd_rows = jnp.zeros((C_out, K * C_pad1), jnp.float32)
    wd_rows = wd_rows.at[:, (K - 1) * C_pad1:(K - 1) * C_pad1 + C_in].set(wd)

    w1d = jnp.concatenate([
        jnp.concatenate([flat(w1, C_pad1), eff["b1"][:, None]], axis=1),
        jnp.concatenate([wd_rows, bd[:, None]], axis=1),
    ], axis=0).astype(jnp.float32)                    # (2*C_out, K*C_pad1 + 1)
    w2p = jnp.concatenate([flat(w2, C_pad2), eff["b2"][:, None]],
                          axis=1).astype(jnp.float32) # (C_out, K*C_pad2 + 1)
    return dict(w1d=w1d, w2=w2p)


def _ref_forward(x_ncl, eff, *, dilation):
    """Pure-JAX reference (NCL layout) for the correctness check."""
    def cc(x, w, b, dil):  # x: (B, C_in, L), w: (C_out, C_in, K)
        K = w.shape[-1]
        L = x.shape[-1]
        pad = (K - 1) * dil
        xp = jnp.pad(x, ((0, 0), (0, 0), (pad, 0)))
        out = b[None, :, None]
        for t in range(K):
            out = out + jnp.einsum("bcl,oc->bol",
                                   xp[:, :, t * dil:t * dil + L], w[:, :, t])
        return out

    x = x_ncl.astype(jnp.float32)
    res = cc(x, eff["wd"], eff["bd"], 1) if eff["wd"] is not None else x
    out1 = jax.nn.relu(cc(x, eff["w1"], eff["b1"], dilation))
    out2 = jax.nn.relu(cc(out1, eff["w2"], eff["b2"], dilation))
    return jax.nn.relu(out2 + res)


if __name__ == "__main__":
    # TemporalBlock(n_inputs=4, n_outputs=8, kernel_size=3, stride=1,
    #               dilation=2, padding=(3-1)*2)
    B, C_IN, C_OUT, L, K, DIL = 2, 4, 8, 16, 3, 2

    key = jax.random.PRNGKey(0)
    kx, kp = jax.random.split(key)
    x = jax.random.normal(kx, (B, C_IN, L), jnp.float32)   # PyTorch NCL layout
    raw = init_params(kp, C_IN, C_OUT, K)
    eff = effective_weights(raw)
    packed = pack_params(eff, kernel_size=K)

    y = temporal_block_forward(x, packed, kernel_size=K, dilation=DIL)
    jax.block_until_ready(y)

    y_ref = _ref_forward(x, eff, dilation=DIL)
    assert y.shape == (B, C_OUT, L)
    assert jnp.allclose(y, y_ref, atol=1e-5, rtol=1e-5)

    print("KERNEL_OK")
</pallas_src>

<mosaic_0001>
module attributes {stable_mosaic.version = 11 : i64} {
  func.func @_temporal_block_kernel(%arg0: memref<2x4x16xf32, #tpu.memory_space<vmem>>, %arg1: memref<16x25xf32, #tpu.memory_space<vmem>>, %arg2: memref<8x25xf32, #tpu.memory_space<vmem>>, %arg3: memref<2x8x16xf32, #tpu.memory_space<vmem>>) attributes {dimension_semantics = [], scalar_prefetch = 0 : i64, scratch_operands = 0 : i64, tpu.core_type = #tpu.core_type<tc>} {
    %c0 = arith.constant 0 : index
    %c0_0 = arith.constant 0 : index
    %c0_1 = arith.constant 0 : index
    %0 = vector.load %arg0[%c0, %c0_0, %c0_1] : memref<2x4x16xf32, #tpu.memory_space<vmem>>, vector<1x4x16xf32>
    %1 = vector.shape_cast %0 : vector<1x4x16xf32> to vector<4x16xf32>
    %c1 = arith.constant 1 : index
    %c0_2 = arith.constant 0 : index
    %c0_3 = arith.constant 0 : index
    %2 = vector.load %arg0[%c1, %c0_2, %c0_3] : memref<2x4x16xf32, #tpu.memory_space<vmem>>, vector<1x4x16xf32>
    %3 = vector.shape_cast %2 : vector<1x4x16xf32> to vector<4x16xf32>
    %4 = tpu.concatenate %1, %3 in 1 : vector<4x16xf32>, vector<4x16xf32> -> vector<4x32xf32>
    %cst = arith.constant 0.000000e+00 : f32
    %5 = vector.broadcast %cst : f32 to vector<4x32xf32>
    %6 = tpu.concatenate %4, %5 in 0 : vector<4x32xf32>, vector<4x32xf32> -> vector<8x32xf32>
    %cst_4 = arith.constant 1.000000e+00 : f32
    %7 = vector.broadcast %cst_4 : f32 to vector<1x32xf32>
    %8 = tpu.iota {dimensions = array<i32: 1>} : vector<8x32xi32>
    %c16_i32 = arith.constant 16 : i32
    %c0_i32 = arith.constant 0 : i32
    %9 = arith.cmpi eq, %c16_i32, %c0_i32 : i32
    %c1_i32 = arith.constant 1 : i32
    %10 = arith.select %9, %c1_i32, %c16_i32 : i32
    %11 = vector.broadcast %10 : i32 to vector<8x32xi32>
    %12 = arith.remsi %8, %11 : vector<8x32xi32>
    %c0_i32_5 = arith.constant 0 : i32
    %13 = vector.broadcast %c0_i32_5 : i32 to vector<8x32xi32>
    %14 = arith.cmpi ne, %12, %13 : vector<8x32xi32>
    %c0_i32_6 = arith.constant 0 : i32
    %15 = vector.broadcast %c0_i32_6 : i32 to vector<8x32xi32>
    %16 = arith.cmpi slt, %12, %15 : vector<8x32xi32>
    %c0_i32_7 = arith.constant 0 : i32
    %17 = arith.cmpi slt, %10, %c0_i32_7 : i32
    %18 = vector.broadcast %17 : i1 to vector<8x32xi1>
    %19 = vector.broadcast %18 : vector<8x32xi1> to vector<8x32xi1>
    %20 = arith.xori %16, %19 : vector<8x32xi1>
    %21 = arith.andi %20, %14 : vector<8x32xi1>
    %22 = vector.broadcast %10 : i32 to vector<8x32xi32>
    %23 = arith.addi %12, %22 : vector<8x32xi32>
    %24 = arith.select %21, %23, %12 : vector<8x32xi1>, vector<8x32xi32>
    %cst_8 = arith.constant 0.000000e+00 : f32
    %25 = vector.broadcast %cst_8 : f32 to vector<8x4xf32>
    %26 = vector.extract_strided_slice %6 {offsets = [0, 0], sizes = [8, 28], strides = [1, 1]} : vector<8x32xf32> to vector<8x28xf32>
    %27 = tpu.concatenate %25, %26 in 1 : vector<8x4xf32>, vector<8x28xf32> -> vector<8x32xf32>
    %c4_i32 = arith.constant 4 : i32
    %28 = vector.broadcast %c4_i32 : i32 to vector<8x32xi32>
    %29 = arith.cmpi sge, %24, %28 : vector<8x32xi32>
    %cst_9 = arith.constant 0.000000e+00 : f32
    %30 = vector.broadcast %cst_9 : f32 to vector<8x32xf32>
    %31 = arith.select %29, %27, %30 : vector<8x32xi1>, vector<8x32xf32>
    %cst_10 = arith.constant 0.000000e+00 : f32
    %32 = vector.broadcast %cst_10 : f32 to vector<8x2xf32>
    %33 = vector.extract_strided_slice %6 {offsets = [0, 0], sizes = [8, 30], strides = [1, 1]} : vector<8x32xf32> to vector<8x30xf32>
    %34 = tpu.concatenate %32, %33 in 1 : vector<8x2xf32>, vector<8x30xf32> -> vector<8x32xf32>
    %c2_i32 = arith.constant 2 : i32
    %35 = vector.broadcast %c2_i32 : i32 to vector<8x32xi32>
    %36 = arith.cmpi sge, %24, %35 : vector<8x32xi32>
    %cst_11 = arith.constant 0.000000e+00 : f32
    %37 = vector.broadcast %cst_11 : f32 to vector<8x32xf32>
    %38 = arith.select %36, %34, %37 : vector<8x32xi1>, vector<8x32xf32>
    %39 = tpu.concatenate %31, %38, %6, %7 in 0 : vector<8x32xf32>, vector<8x32xf32>, vector<8x32xf32>, vector<1x32xf32> -> vector<25x32xf32>
    %c0_12 = arith.constant 0 : index
    %c0_13 = arith.constant 0 : index
    %40 = vector.load %arg1[%c0_12, %c0_13] : memref<16x25xf32, #tpu.memory_space<vmem>>, vector<16x25xf32>
    %cst_14 = arith.constant dense<0.000000e+00> : vector<16x32xf32>
    %41 = tpu.matmul %40, %39, %cst_14 {dimension_numbers = #tpu.dot_dimension_numbers<[1], [0], [0], [1], [0, 0, 1, 1], [], []>} : vector<16x25xf32>, vector<25x32xf32>, vector<16x32xf32> -> vector<16x32xf32>
    %42 = vector.extract_strided_slice %41 {offsets = [0, 0], sizes = [8, 32], strides = [1, 1]} : vector<16x32xf32> to vector<8x32xf32>
    %cst_15 = arith.constant 0.000000e+00 : f32
    %43 = vector.broadcast %cst_15 : f32 to vector<8x32xf32>
    %44 = arith.maximumf %42, %43 : vector<8x32xf32>
    %45 = vector.extract_strided_slice %41 {offsets = [8, 0], sizes = [8, 32], strides = [1, 1]} : vector<16x32xf32> to vector<8x32xf32>
    %46 = tpu.iota {dimensions = array<i32: 1>} : vector<8x32xi32>
    %c16_i32_16 = arith.constant 16 : i32
    %c0_i32_17 = arith.constant 0 : i32
    %47 = arith.cmpi eq, %c16_i32_16, %c0_i32_17 : i32
    %c1_i32_18 = arith.constant 1 : i32
    %48 = arith.select %47, %c1_i32_18, %c16_i32_16 : i32
    %49 = vector.broadcast %48 : i32 to vector<8x32xi32>
    %50 = arith.remsi %46, %49 : vector<8x32xi32>
    %c0_i32_19 = arith.constant 0 : i32
    %51 = vector.broadcast %c0_i32_19 : i32 to vector<8x32xi32>
    %52 = arith.cmpi ne, %50, %51 : vector<8x32xi32>
    %c0_i32_20 = arith.constant 0 : i32
    %53 = vector.broadcast %c0_i32_20 : i32 to vector<8x32xi32>
    %54 = arith.cmpi slt, %50, %53 : vector<8x32xi32>
    %c0_i32_21 = arith.constant 0 : i32
    %55 = arith.cmpi slt, %48, %c0_i32_21 : i32
    %56 = vector.broadcast %55 : i1 to vector<8x32xi1>
    %57 = vector.broadcast %56 : vector<8x32xi1> to vector<8x32xi1>
    %58 = arith.xori %54, %57 : vector<8x32xi1>
    %59 = arith.andi %58, %52 : vector<8x32xi1>
    %60 = vector.broadcast %48 : i32 to vector<8x32xi32>
    %61 = arith.addi %50, %60 : vector<8x32xi32>
    %62 = arith.select %59, %61, %50 : vector<8x32xi1>, vector<8x32xi32>
    %cst_22 = arith.constant 0.000000e+00 : f32
    %63 = vector.broadcast %cst_22 : f32 to vector<8x4xf32>
    %64 = vector.extract_strided_slice %44 {offsets = [0, 0], sizes = [8, 28], strides = [1, 1]} : vector<8x32xf32> to vector<8x28xf32>
    %65 = tpu.concatenate %63, %64 in 1 : vector<8x4xf32>, vector<8x28xf32> -> vector<8x32xf32>
    %c4_i32_23 = arith.constant 4 : i32
    %66 = vector.broadcast %c4_i32_23 : i32 to vector<8x32xi32>
    %67 = arith.cmpi sge, %62, %66 : vector<8x32xi32>
    %cst_24 = arith.constant 0.000000e+00 : f32
    %68 = vector.broadcast %cst_24 : f32 to vector<8x32xf32>
    %69 = arith.select %67, %65, %68 : vector<8x32xi1>, vector<8x32xf32>
    %cst_25 = arith.constant 0.000000e+00 : f32
    %70 = vector.broadcast %cst_25 : f32 to vector<8x2xf32>
    %71 = vector.extract_strided_slice %44 {offsets = [0, 0], sizes = [8, 30], strides = [1, 1]} : vector<8x32xf32> to vector<8x30xf32>
    %72 = tpu.concatenate %70, %71 in 1 : vector<8x2xf32>, vector<8x30xf32> -> vector<8x32xf32>
    %c2_i32_26 = arith.constant 2 : i32
    %73 = vector.broadcast %c2_i32_26 : i32 to vector<8x32xi32>
    %74 = arith.cmpi sge, %62, %73 : vector<8x32xi32>
    %cst_27 = arith.constant 0.000000e+00 : f32
    %75 = vector.broadcast %cst_27 : f32 to vector<8x32xf32>
    %76 = arith.select %74, %72, %75 : vector<8x32xi1>, vector<8x32xf32>
    %77 = tpu.concatenate %69, %76, %44, %7 in 0 : vector<8x32xf32>, vector<8x32xf32>, vector<8x32xf32>, vector<1x32xf32> -> vector<25x32xf32>
    %c0_28 = arith.constant 0 : index
    %c0_29 = arith.constant 0 : index
    %78 = vector.load %arg2[%c0_28, %c0_29] : memref<8x25xf32, #tpu.memory_space<vmem>>, vector<8x25xf32>
    %cst_30 = arith.constant dense<0.000000e+00> : vector<8x32xf32>
    %79 = tpu.matmul %78, %77, %cst_30 {dimension_numbers = #tpu.dot_dimension_numbers<[1], [0], [0], [1], [0, 0, 1, 1], [], []>} : vector<8x25xf32>, vector<25x32xf32>, vector<8x32xf32> -> vector<8x32xf32>
    %cst_31 = arith.constant 0.000000e+00 : f32
    %80 = vector.broadcast %cst_31 : f32 to vector<8x32xf32>
    %81 = arith.maximumf %79, %80 : vector<8x32xf32>
    %82 = arith.addf %81, %45 : vector<8x32xf32>
    %cst_32 = arith.constant 0.000000e+00 : f32
    %83 = vector.broadcast %cst_32 : f32 to vector<8x32xf32>
    %84 = arith.maximumf %82, %83 : vector<8x32xf32>
    %85 = vector.extract_strided_slice %84 {offsets = [0, 0], sizes = [8, 16], strides = [1, 1]} : vector<8x32xf32> to vector<8x16xf32>
    %c0_33 = arith.constant 0 : index
    %c0_34 = arith.constant 0 : index
    %c0_35 = arith.constant 0 : index
    %86 = vector.load %arg3[%c0_33, %c0_34, %c0_35] : memref<2x8x16xf32, #tpu.memory_space<vmem>>, vector<1x8x16xf32>
    %87 = vector.shape_cast %86 : vector<1x8x16xf32> to vector<8x16xf32>
    %88 = vector.shape_cast %85 : vector<8x16xf32> to vector<1x8x16xf32>
    tpu.vector_store %arg3[%c0_33, %c0_34, %c0_35], %88 {strides = array<i32>} : memref<2x8x16xf32, #tpu.memory_space<vmem>>, vector<1x8x16xf32>,
    %89 = vector.extract_strided_slice %84 {offsets = [0, 16], sizes = [8, 16], strides = [1, 1]} : vector<8x32xf32> to vector<8x16xf32>
    %c1_36 = arith.constant 1 : index
    %c0_37 = arith.constant 0 : index
    %c0_38 = arith.constant 0 : index
    %90 = vector.load %arg3[%c1_36, %c0_37, %c0_38] : memref<2x8x16xf32, #tpu.memory_space<vmem>>, vector<1x8x16xf32>
    %91 = vector.shape_cast %90 : vector<1x8x16xf32> to vector<8x16xf32>
    %92 = vector.shape_cast %89 : vector<8x16xf32> to vector<1x8x16xf32>
    tpu.vector_store %arg3[%c1_36, %c0_37, %c0_38], %92 {strides = array<i32>} : memref<2x8x16xf32, #tpu.memory_space<vmem>>, vector<1x8x16xf32>,
    return
  }
}

</mosaic_0001>

<bundles_post_ra>
// kernel: tpu_custom_call.1
= control target key start
LH: loop header
LB: loop body
LE: loop exit
PB: predicated region body
PF: predicated region fallthrough
CT: control target
= control target key end

     0   :  { %8 = vsyncpa [#allocation3], 0  ;;  %s527_s0 = inlined_call_operand.hbm [shape: f32[2,4,16], index: 0, kind: input, shape index: {}]   ;;  %s528_s1 = inlined_call_operand.hbm [shape: f32[16,25], index: 1, kind: input, shape index: {}]   ;;  %s529_s2 = inlined_call_operand.hbm [shape: f32[8,25], index: 2, kind: input, shape index: {}]   ;;  %s530_s3 = inlined_call_operand.hbm [shape: f32[2,8,16], index: 3, kind: output, shape index: {}]  }
   0x1   :  { %9 = vsyncpa [#allocation6], 0 }
   0x2   :  { %10 = vsyncpa [#allocation4], 0  ;;  %s439_s12 = smov [#allocation5]  }
   0x3   :  { %s28_s13 = sshll.u32 %s439_s12, 4  ;;  %s29_s13 = int_to_ptr.vmem [resolvable:$true] %s28_s13 }
   0x4   :  { %s361_s14 = scalar_lea.vmem %s29_s13, 256  ;;  %p366_p1 = scmp.lt.s32.totalorder %s29_s13, %s29_s13 }
   0x5   :  { %p362_p0 = scmp.ne.s32.totalorder %s29_s13, %s361_s14  ;;  %p367_p2 = scmp.lt.s32.totalorder %s361_s14, %s361_s14 }
   0x7   :  { %p368_p3 = por %p367_p2, %p366_p1 }
   0x9   :  { %p369_p4 = pnand %p368_p3, %p362_p0 }
   0xb   :  { %372 = shalt.err (!%p369_p4)
}
   0xc   :  { %s440_s15 = smov 128   ;;  %s441_s16 = smov 8  }
   0xd   :  { %34 = dma.hbm_to_vmem [thread:$0]  %s528_s1, 256, %s29_s13, [#allocation6], %s440_s15, %s440_s15, %s441_s16  }
   0xe   :  { %s442_s19 = smov [#allocation2]  }
   0xf   :  { %s16_s20 = sshll.u32 %s442_s19, 4  ;;  %s17_s20 = int_to_ptr.vmem [resolvable:$true] %s16_s20 }
  0x10   :  { %s381_s21 = scalar_lea.vmem %s17_s20, 128  ;;  %p386_p6 = scmp.lt.s32.totalorder %s17_s20, %s17_s20 }
  0x11   :  { %p382_p5 = scmp.ne.s32.totalorder %s17_s20, %s381_s21  ;;  %p387_p7 = scmp.lt.s32.totalorder %s381_s21, %s381_s21 }
  0x13   :  { %p388_p8 = por %p387_p7, %p386_p6 }
  0x15   :  { %p389_p9 = pnand %p388_p8, %p382_p5 }
  0x17   :  { %392 = shalt.err (!%p389_p9)
}
  0x18   :  { %s443_s22 = smov 64   ;;  %s444_s23 = smov 4  }
  0x19   :  { %22 = dma.hbm_to_vmem [thread:$0]  %s527_s0, 128, %s17_s20, [#allocation3], %s443_s22, %s443_s22, %s444_s23  }
  0x1a   :  { %s445_s26 = smov [#allocation7]  }
  0x1b   :  { %s41_s27 = sshll.u32 %s445_s26, 4  ;;  %s42_s27 = int_to_ptr.vmem [resolvable:$true] %s41_s27 }
  0x1c   :  { %s401_s1 = scalar_lea.vmem %s42_s27, 128  ;;  %p406_p11 = scmp.lt.s32.totalorder %s42_s27, %s42_s27 }
  0x1d   :  { %p402_p10 = scmp.ne.s32.totalorder %s42_s27, %s401_s1  ;;  %p407_p12 = scmp.lt.s32.totalorder %s401_s1, %s401_s1 }
  0x1f   :  { %p408_p13 = por %p407_p12, %p406_p11 }
  0x21   :  { %p409_p0 = pnand %p408_p13, %p402_p10 }
  0x23   :  { %412 = shalt.err (!%p409_p0)
}
  0x24   :  { %44 = dma.hbm_to_vmem [thread:$0]  %s529_s2, 128, %s42_s27, [#allocation6]  }
  0x25   :  { %433 = dma.done.wait [#allocation3], 128  }
  0x26   :  { %434 = vsyncadd [#allocation3], 4294967168 }
  0x27   :  { %435 = dma.done.wait [#allocation6], 384  }
  0x28   :  { %436 = vsyncadd [#allocation6], 4294966912  ;;  %vm103_vm0 = vcmask 1040384   ;;  %v446_v0 = vmov 1.0   ;;  %v56_v1 = vld [vmem:[#allocation2 + $0x4] sm:$0xf]  ;;  %v65_v7 = vlaneseq }
  0x29   :  { %317 = vmatprep.subr.msk.mxu0 %vm103_vm0, %v446_v0  ;;  %s447_s0 = smov 16   ;;  %v94_v2 = vld [vmem:[#allocation5] sm:$0xff]  ;;  %vm96_vm1 = vcmask 203776   ;;  %vm61_vm2 = vcmask 130048   ;;  %v54_v3 = vld [vmem:[#allocation2] sm:$0xf] }
  0x2a   :  { %318 = vmatpush3.msk.msra.mxu0 %vm103_vm0, %v446_v0  ;;  %58 = vrot.lane.b32.xlu0 %v56_v1, %s447_s0  ;;  %vm63_vm3 = vcmask 1043456   ;;  %s448_s2 = smov 2   ;;  %v66_v8 = vand.u32 127, %v65_v7  ;;  %vm90_vm4 = vcmask 15360   ;;  %vm83_vm6 = vcmask 31744   ;;  %v95_v16 = vld [vmem:[#allocation5 + $0x8] sm:$0xff] }
  0x2b   :  { %325 = vmatprep.mubr.msk.f32.mxu0 %vm96_vm1, %v94_v2  ;;  %v449_v17 = vmov 0.0   ;;  %vm450_vm8 = vmmov 0   ;;  %v194_v24 = vld [vmem:[#allocation7] sm:$0xff]  ;;  %s451_s30 = smov 112   ;;  %s452_s4 = smov [#allocation8]  }
  0x2c   :  { %v71_v9 = vand.u32 15, %v66_v8  ;;  %328 = vmatprep.subr.mxu1 %v449_v17  ;;  %336 = vmatprep.mubr.msk.f32.mxu1 %vm450_vm8, %v449_v17  ;;  %s283_s5 = sshll.u32 %s452_s4, 4  ;;  %s284_s5 = int_to_ptr.vmem [resolvable:$true] %s283_s5 }
  0x2d   :  { %329 = vmatpush3.msk.msra.mxu1 %vm103_vm0, %v446_v0  ;;  %s413_s6 = scalar_lea.vmem %s284_s5, 256  ;;  %p418_p2 = scmp.lt.s32.totalorder %s284_s5, %s284_s5 }
  0x2e   :  { %vm491_vm5 = vcmp.ge.s32.totalorder %v71_v9, 2  ;;  %vm496_vm7 = vcmp.ge.s32.totalorder %v71_v9, 4  ;;  %330 = vmatprep.subr.mxu1 %v449_v17  ;;  %p414_p1 = scmp.ne.s32.totalorder %s284_s5, %s413_s6  ;;  %p419_p3 = scmp.lt.s32.totalorder %s413_s6, %s413_s6 }
  0x30   :  { %p420_p4 = por %p419_p3, %p418_p2 }
  0x32   :  { %p421_p5 = pnand %p420_p4, %p414_p1 }
  0x9c   :  { %v59_v4 = vpop.permute.xlu0 %58 }
  0x9d   :  { %v62_v5 = vsel %vm61_vm2, %v54_v3, %v59_v4 }
  0x9e   :  { %319 = vmatprep.subr.msk.mxu0 %vm63_vm3, %v62_v5  ;;  %v64_v6 = vsel %vm63_vm3, %v62_v5, 0.0 }
  0x9f   :  { %320 = vmatpush3.msk.msra.mxu0 %vm63_vm3, %v62_v5  ;;  %80 = vrot.lane.b32.xlu1 %v64_v6, %s444_s23 }
  0xa0   :  { %87 = vrot.lane.b32.xlu0 %v64_v6, %s448_s2 }
 0x111   :  { %v81_v11 = vpop.permute.xlu1 %80 }
 0x112   :  { %v88_v12 = vpop.permute.xlu0 %87  ;;  %v84_v15 = vsel %vm83_vm6, 0.0, %v81_v11 }
 0x113   :  { %v91_v13 = vsel %vm90_vm4, 0.0, %v88_v12 }
 0x114   :  { %321 = vmatprep.subr.msk.mxu0 %vm491_vm5, %v91_v13 }
 0x115   :  { %322 = vmatpush3.msk.msra.mxu0 %vm491_vm5, %v91_v13 }
 0x116   :  { %323 = vmatprep.subr.msk.mxu0 %vm496_vm7, %v84_v15 }
 0x117   :  { %324 = vmatpush3.msk.msra.mxu0 %vm496_vm7, %v84_v15 }
 0x118   :  { %326 = vmatmul.mubr.msk.f32.vlgmr.msra.gmra.mxu0 %vm96_vm1, %v95_v16 }
 0x1d8   :  { %v327_v18 = vpop.f32.mrf.mxu0 }
 0x1da   :  { %v173_v19 = vpop.f32.mrf.mxu0 }
 0x1db   :  { %v182_v20 = vmax.f32 %v173_v19, 0.0 }
 0x1dd   :  { %184 = vrot.lane.b32.xlu0 %v182_v20, %s444_s23  ;;  %189 = vrot.lane.b32.xlu1 %v182_v20, %s448_s2 }
 0x1de   :  { %331 = vmatpush3.msra.mxu1 %v182_v20 }
 0x1df   :  { %332 = vmatprep.subr.mxu1 %v449_v17 }
 0x24f   :  { %v185_v21 = vpop.permute.xlu0 %184  ;;  %v190_v22 = vpop.permute.xlu1 %189 }
 0x250   :  { %v192_v23 = vsel %vm90_vm4, 0.0, %v190_v22  ;;  %v187_v25 = vsel %vm83_vm6, 0.0, %v185_v21 }
 0x251   :  { %333 = vmatpush3.msk.msra.mxu1 %vm491_vm5, %v192_v23 }
 0x252   :  { %334 = vmatprep.subr.mxu1 %v449_v17 }
 0x253   :  { %335 = vmatpush3.msk.msra.mxu1 %vm496_vm7, %v187_v25 }
 0x254   :  { %337 = vmatmul.mubr.msk.f32.vlgmr.msra.gmra.mxu1 %vm96_vm1, %v194_v24 }
 0x314   :  { %v264_v26 = vpop.f32.mrf.mxu1 }
 0x315   :  { %v268_v27 = vmax.f32 %v264_v26, 0.0 }
 0x316   :  { %v338_v28 = vpop.f32.mrf.mxu1 }
 0x317   :  { %v269_v29 = vadd.f32 %v327_v18, %v268_v27 }
 0x319   :  { %v270_v30 = vmax.f32 %v269_v29, 0.0 }
 0x31b   :  { %271 = vst.msk [vmem:[#allocation8] sm:$0xff] %vm61_vm2, %v270_v30  ;;  %273 = vrot.lane.b32.xlu1 %v270_v30, %s451_s30 }
 0x38d   :  { %v274_v31 = vpop.permute.xlu1 %273 }
 0x38e   :  { %277 = vst.msk [vmem:[#allocation8 + $0x8] sm:$0xff] %vm61_vm2, %v274_v31 }
 0x38f   :  { %424 = shalt.err (!%p421_p5)
}
 0x390   :  { %289 = dma.vmem_to_hbm [thread:$0]  %s284_s5, 256, %s530_s3, [#allocation4], %s440_s15, %s440_s15, %s441_s16  }
 0x391   :  { %437 = dma.done.wait [#allocation4], 256  }
 0x392   :  { %438 = vsyncadd [#allocation4], 4294967040 }
 0x393   :  { %293 = vsyncpa [#allocation3], 1 }
 0x394   :  { %294 = vsyncpa [#allocation6], 1 }
 0x395   :  { %295 = vsyncpa [#allocation4], 1 }

</bundles_post_ra>
